<compile_context>
chip_gen: v7x
topology: tpu7x:2x2x1
jax: 0.10.0
libtpu: 0.0.40
codegen_flags: <defaults>
</compile_context>

<pallas_src>
import math
from functools import partial

import jax
import jax.numpy as jnp
from jax.experimental import pallas as pl
from jax.experimental.pallas import tpu as pltpu


def _identity_kernel(x_ref, o_ref):
    # One full-tile vector copy per grid step (pure DMA-bound pass-through).
    o_ref[...] = x_ref[...]


# Per-block byte budget: 4 buffers (double-buffered in + out) * 4 MiB = 16 MiB,
# comfortably inside the 32 MiB scoped-VMEM limit requested below.
_TILE_CAP_BYTES = 4 * 1024 * 1024

# Candidate lane widths for the lane-dense slab (widest first).
_WIDTH_CANDIDATES = (65536, 32768, 16384, 8192, 4096, 2048, 1024, 512, 256, 128)


def _copy_2d_impl(x2d, *, alias):
    rows, cols = x2d.shape
    itemsize = x2d.dtype.itemsize
    sub = max(8, 32 // itemsize)  # dtype-aware sublane multiple (f32:8 bf16:16 i8:32)
    lane = 128

    # Column blocking: keep the full width when it fits the per-block budget
    # (always true on the lane-dense aligned path since width <= 64K elems);
    # otherwise chunk in 128-lane multiples (trailing partial block is masked).
    if cols * itemsize <= _TILE_CAP_BYTES:
        block_cols = cols
    else:
        block_cols = max(lane, (_TILE_CAP_BYTES // itemsize) // lane * lane)

    # Row blocking: largest sublane-multiple under the budget, or the full
    # extent when it already fits (full-extent block dims are always legal,
    # even when not a multiple of 8).
    max_rows = max(sub, (_TILE_CAP_BYTES // (block_cols * itemsize)) // sub * sub)
    block_rows = rows if rows <= max_rows else max_rows

    grid = (pl.cdiv(rows, block_rows), pl.cdiv(cols, block_cols))

    return pl.pallas_call(
        _identity_kernel,
        out_shape=jax.ShapeDtypeStruct((rows, cols), x2d.dtype),
        grid=grid,
        in_specs=[pl.BlockSpec((block_rows, block_cols), lambda i, j: (i, j))],
        out_specs=pl.BlockSpec((block_rows, block_cols), lambda i, j: (i, j)),
        input_output_aliases=({0: 0} if alias else {}),
        compiler_params=pltpu.CompilerParams(
            dimension_semantics=("parallel", "parallel"),
            vmem_limit_bytes=32 * 1024 * 1024,
        ),
    )(x2d)


# Donating variant: the 2-D slab is a wrapper-local intermediate (fresh buffer
# produced by the reshape), so its HBM buffer can be handed straight to the
# output via input_output_aliases -- zero extra allocation for the identity.
_copy_2d_donated = jax.jit(partial(_copy_2d_impl, alias=True), donate_argnums=(0,))
# Non-donating variant, used only if the reshape was a no-op and returned the
# caller's array object itself (we must not invalidate the caller's buffer).
_copy_2d_plain = jax.jit(partial(_copy_2d_impl, alias=False))


def hook_point_forward(x):
    """Pallas implementation of HookPoint.forward: returns x unchanged."""
    # TODO(synk): fwd/bwd hook registration and self.ctx are host-side Python
    # bookkeeping with no device compute; only the identity forward is a kernel.
    orig_shape = x.shape
    total = math.prod(orig_shape) if orig_shape else 1

    if total == 0:
        # Empty tensor: nothing to copy.
        return x

    if total % 128 == 0:
        # Lane-dense slab: widest 128-multiple that divides the element count,
        # so there is no padding and no trailing partial (masked) block.
        width = next(w for w in _WIDTH_CANDIDATES if total % w == 0)
        rows = total // width
    else:
        # Ragged size: single full-extent row; block == full dims is always
        # legal, and huge ragged tensors get chunked along lanes in the impl.
        width = total
        rows = 1

    x2d = jnp.reshape(x, (rows, width))
    copy_fn = _copy_2d_plain if x2d is x else _copy_2d_donated
    y2d = copy_fn(x2d)
    return jnp.reshape(y2d, orig_shape)


if __name__ == "__main__":
    key = jax.random.PRNGKey(0)
    k1, k2, k3 = jax.random.split(key, 3)

    # NCHW-style activation (aligned, lane-dense path).
    x_nchw = jax.random.normal(k1, (2, 4, 16, 16), dtype=jnp.float32)
    y_nchw = jax.block_until_ready(hook_point_forward(x_nchw))
    assert y_nchw.shape == x_nchw.shape, (y_nchw.shape, x_nchw.shape)
    assert y_nchw.dtype == x_nchw.dtype, (y_nchw.dtype, x_nchw.dtype)
    assert bool(jnp.all(y_nchw == x_nchw)), "identity kernel mismatch (f32)"

    # bf16 (batch=2, seq=8, hidden=32) activation (dtype-aware sublane multiple).
    x_bf16 = jax.random.normal(k2, (2, 8, 32), dtype=jnp.float32).astype(jnp.bfloat16)
    y_bf16 = jax.block_until_ready(hook_point_forward(x_bf16))
    assert y_bf16.shape == x_bf16.shape and y_bf16.dtype == x_bf16.dtype
    assert bool(jnp.all(y_bf16 == x_bf16)), "identity kernel mismatch (bf16)"

    # Size not divisible by 128 -> full-extent block path (no padding).
    x_odd = jax.random.normal(k3, (3, 5, 7), dtype=jnp.float32)
    y_odd = jax.block_until_ready(hook_point_forward(x_odd))
    assert y_odd.shape == x_odd.shape and bool(jnp.all(y_odd == x_odd))

    # Zero-size input passes straight through.
    x_empty = jnp.zeros((2, 0, 4), dtype=jnp.float32)
    y_empty = hook_point_forward(x_empty)
    assert y_empty.shape == x_empty.shape

    print("KERNEL_OK")
</pallas_src>

<mosaic_0001>
module attributes {stable_mosaic.version = 11 : i64} {
  func.func @_identity_kernel(%arg0: i32, %arg1: i32, %arg2: memref<1x2048xf32, #tpu.memory_space<vmem>>, %arg3: memref<1x2048xf32, #tpu.memory_space<vmem>>) attributes {dimension_semantics = [#tpu.dimension_semantics<parallel>, #tpu.dimension_semantics<parallel>], iteration_bounds = array<i64: 1, 1>, scalar_prefetch = 0 : i64, scratch_operands = 0 : i64, tpu.core_type = #tpu.core_type<tc>, window_params = [{transform_indices = @transform_0, window_bounds = array<i64: 1, 2048>}, {transform_indices = @transform_1, window_bounds = array<i64: 1, 2048>}]} {
    %c0 = arith.constant 0 : index
    %c0_0 = arith.constant 0 : index
    %0 = vector.load %arg2[%c0, %c0_0] : memref<1x2048xf32, #tpu.memory_space<vmem>>, vector<1x2048xf32>
    %c0_1 = arith.constant 0 : index
    %c0_2 = arith.constant 0 : index
    %1 = vector.load %arg3[%c0_1, %c0_2] : memref<1x2048xf32, #tpu.memory_space<vmem>>, vector<1x2048xf32>
    tpu.vector_store %arg3[%c0_1, %c0_2], %0 {strides = array<i32>} : memref<1x2048xf32, #tpu.memory_space<vmem>>, vector<1x2048xf32>,
    return
  }
  func.func @transform_0(%arg0: i32, %arg1: i32) -> (i32, i32) {
    %c0_i32 = arith.constant 0 : i32
    return %arg0, %arg1 : i32, i32
  }
  func.func @transform_1(%arg0: i32, %arg1: i32) -> (i32, i32) {
    %c0_i32 = arith.constant 0 : i32
    return %arg0, %arg1 : i32, i32
  }
}

</mosaic_0001>

<bundles_post_ra>
// kernel: _copy_2d_impl.1
= control target key start
LH: loop header
LB: loop body
LE: loop exit
PB: predicated region body
PF: predicated region fallthrough
CT: control target
= control target key end

     0   :  { %6 = vsyncpa [#allocation3], 0  ;;  %s126_s0 = inlined_call_operand.hbm [shape: f32[1,2048], index: 0, kind: input, shape index: {}, may-alias: {0,1}]   ;;  %s127_s1 = inlined_call_operand.hbm [shape: f32[1,2048], index: 1, kind: output, shape index: {}, may-alias: {0,1}]  }
   0x1   :  { %7 = vsyncpa [#allocation4], 0  ;;  %s90_s6 = smov [#allocation2]   ;;  %s42_s10 = scalar_lea.hbm %s126_s0, 256 }
   0x2   :  { %s14_s7 = sshll.u32 %s90_s6, 4  ;;  %p43_p0 = scmp.ne.s32.totalorder %s126_s0, %s42_s10  ;;  %s15_s7 = int_to_ptr.vmem [resolvable:$true] %s14_s7 }
   0x3   :  { %p46_p1 = scmp.lt.u32.totalorder %s42_s10, %s126_s0 }
   0x5   :  { %p48_p2 = pnand %p46_p1, %p43_p0 }
   0x7   :  { %51 = shalt.err (!%p48_p2)
}
   0x8   :  { %s52_s15 = scalar_lea.vmem %s15_s7, 256  ;;  %p57_p4 = scmp.lt.s32.totalorder %s15_s7, %s15_s7 }
   0x9   :  { %p53_p3 = scmp.ne.s32.totalorder %s15_s7, %s52_s15  ;;  %p58_p5 = scmp.lt.s32.totalorder %s52_s15, %s52_s15 }
   0xb   :  { %p59_p6 = por %p58_p5, %p57_p4 }
   0xd   :  { %p60_p7 = pnand %p59_p6, %p53_p3 }
   0xf   :  { %63 = shalt.err (!%p60_p7)
}
  0x10   :  { %17 = dma.hbm_to_vmem [thread:$0]  %s126_s0, 256, %s15_s7, [#allocation3]  }
  0x11   :  { %86 = dma.done.wait [#allocation3], 256  }
  0x12   :  { %87 = vsyncadd [#allocation3], 4294967040  ;;  %s91_s18 = smov [#allocation5]   ;;  %v21_v0 = vld [vmem:[#allocation2] sm:$0xff]  ;;  %v22_v1 = vld [vmem:[#allocation2 + $0x8] sm:$0xff] }
  0x13   :  { %s31_s19 = sshll.u32 %s91_s18, 4  ;;  %23 = vst [vmem:[#allocation5] sm:$0xff] %v21_v0  ;;  %24 = vst [vmem:[#allocation5 + $0x8] sm:$0xff] %v22_v1  ;;  %s32_s19 = int_to_ptr.vmem [resolvable:$true] %s31_s19 }
  0x14   :  { %s64_s20 = scalar_lea.vmem %s32_s19, 256  ;;  %p69_p9 = scmp.lt.s32.totalorder %s32_s19, %s32_s19 }
  0x15   :  { %p65_p8 = scmp.ne.s32.totalorder %s32_s19, %s64_s20  ;;  %p70_p10 = scmp.lt.s32.totalorder %s64_s20, %s64_s20 }
  0x17   :  { %p71_p11 = por %p70_p10, %p69_p9 }
  0x19   :  { %p72_p12 = pnand %p71_p11, %p65_p8 }
  0x1b   :  { %75 = shalt.err (!%p72_p12)
}
  0x1c   :  { %s76_s0 = scalar_lea.hbm %s127_s1, 256 }
  0x1d   :  { %p77_p13 = scmp.ne.s32.totalorder %s127_s1, %s76_s0  ;;  %p80_p0 = scmp.lt.u32.totalorder %s76_s0, %s127_s1 }
  0x1f   :  { %p82_p1 = pnand %p80_p0, %p77_p13 }
  0x21   :  { %85 = shalt.err (!%p82_p1)
}
  0x22   :  { %34 = dma.vmem_to_hbm [thread:$0]  %s32_s19, 256, %s127_s1, [#allocation4]  }
  0x23   :  { %88 = dma.done.wait [#allocation4], 256  }
  0x24   :  { %89 = vsyncadd [#allocation4], 4294967040 }
  0x25   :  { %38 = vsyncpa [#allocation3], 1 }
  0x26   :  { %39 = vsyncpa [#allocation4], 1 }

</bundles_post_ra>
